<compile_context>
chip_gen: v7x
topology: tpu7x:2x2x1
jax: 0.10.0
libtpu: 0.0.40
codegen_flags: <defaults>
</compile_context>

<pallas_src>
import jax
import jax.numpy as jnp
from jax.experimental import pallas as pl
from jax.experimental.pallas import tpu as pltpu

LANE = 128  # TPU lane width; weight blocks are zero-padded to 128x128.


def _round_up(n: int, m: int) -> int:
    return -(-n // m) * m


def manager_actor_kernel(x_ref, g_ref, w_ref, bs_ref, o_ref):
    """One batch tile of the 3-layer MLP + tanh + per-dim scale.

    x_ref : (TB, sd)   f32   raw state rows (no padding)
    g_ref : (TB, gd)   f32   raw goal rows (no padding)
    w_ref : (512, 128) bf16  rows [0:128]=W1_x, [128:256]=W1_g,
                             [256:384]=W2, [384:512]=W3 (all zero-padded)
    bs_ref: (8, 128)   f32   row 0=b1, 1=b2, 2=b3, 3=scale (zero-padded)
    o_ref : (TB, na)   f32   scale * tanh(mlp([x, g])), only real action lanes
    """
    cdt = w_ref.dtype                       # bf16 compute dtype for MXU operands
    sd = x_ref.shape[1]
    gd = g_ref.shape[1]
    na = o_ref.shape[1]

    xb = x_ref[...].astype(cdt)
    gb = g_ref[...].astype(cdt)

    # Layer 1: relu(x @ W1_x + g @ W1_g + b1)  -- no concatenated/padded input needed.
    h = jnp.dot(xb, w_ref[0:sd, :], preferred_element_type=jnp.float32)
    h = h + jnp.dot(gb, w_ref[LANE:LANE + gd, :], preferred_element_type=jnp.float32)
    h = jnp.maximum(h + bs_ref[0:1, :], 0.0)

    # Layer 2: relu(h @ W2 + b2)
    h = jnp.dot(h.astype(cdt), w_ref[2 * LANE:3 * LANE, :],
                preferred_element_type=jnp.float32)
    h = jnp.maximum(h + bs_ref[1:2, :], 0.0)

    # Layer 3 + tanh (max_action = 1) + per-dim scale, narrowed to the real lanes.
    a = jnp.dot(h.astype(cdt), w_ref[3 * LANE:4 * LANE, :],
                preferred_element_type=jnp.float32)
    a = jnp.tanh(a[:, :na] + bs_ref[2:3, :na])
    o_ref[...] = bs_ref[3:4, :na] * a


def pack_params(params, state_dim, goal_dim, action_dim, hidden=20):
    """Pack ManagerActor params into {weights bf16 (512,128), biases+scale f32 (8,128)}."""
    assert state_dim <= LANE and goal_dim <= LANE
    assert hidden <= LANE and action_dim <= LANE
    # scale has shape (state_dim,) and multiplies the (B, action_dim) output.
    assert action_dim == state_dim, "scale broadcast requires action_dim == state_dim"

    def pad_block(w):
        buf = jnp.zeros((LANE, LANE), jnp.float32)
        return buf.at[: w.shape[0], : w.shape[1]].set(w)

    w1 = params["w1"]                               # (state_dim+goal_dim, hidden) = W1^T
    w_packed = jnp.concatenate(
        [pad_block(w1[:state_dim]),                 # W1_x block at rows [0:128]
         pad_block(w1[state_dim:]),                 # W1_g block at rows [128:256]
         pad_block(params["w2"]),                   # W2   block at rows [256:384]
         pad_block(params["w3"])],                  # W3   block at rows [384:512]
        axis=0,
    ).astype(jnp.bfloat16)

    bs = jnp.zeros((8, LANE), jnp.float32)
    bs = bs.at[0, :hidden].set(params["b1"])
    bs = bs.at[1, :hidden].set(params["b2"])
    bs = bs.at[2, :action_dim].set(params["b3"])
    bs = bs.at[3, :action_dim].set(params["scale"])
    return {"w": w_packed, "bs": bs}


def manager_actor_forward(x, g, w_packed, bs_packed, action_dim, *, block_batch=4096):
    """x: (B, state_dim) f32, g: (B, goal_dim) f32 -> (B, action_dim) f32."""
    B, sd = x.shape
    gd = g.shape[1]
    assert w_packed.shape == (4 * LANE, LANE)
    assert bs_packed.shape == (8, LANE)

    # Batch tile: multiple of 8, capped by the (8-aligned) batch; do NOT round the
    # batch itself up to a multiple of tb -- Pallas handles the partial edge block.
    tb = min(_round_up(block_batch, 8), _round_up(B, 8))
    # v7x megacore: for large batches keep >= 2 grid steps so ("parallel",) feeds both TCs.
    if B >= 256 and pl.cdiv(B, tb) < 2:
        tb = _round_up(pl.cdiv(B, 2), 8)
    grid_b = pl.cdiv(B, tb)

    out = pl.pallas_call(
        manager_actor_kernel,
        out_shape=jax.ShapeDtypeStruct((B, action_dim), jnp.float32),
        grid=(grid_b,),
        in_specs=[
            pl.BlockSpec((tb, sd), lambda i: (i, 0)),          # x: streamed per batch tile
            pl.BlockSpec((tb, gd), lambda i: (i, 0)),          # g: streamed per batch tile
            pl.BlockSpec((4 * LANE, LANE), lambda i: (0, 0)),  # packed weights: VMEM-resident
            pl.BlockSpec((8, LANE), lambda i: (0, 0)),         # biases + scale: resident
        ],
        out_specs=pl.BlockSpec((tb, action_dim), lambda i: (i, 0)),  # narrow writeback
        compiler_params=pltpu.CompilerParams(
            dimension_semantics=("parallel",),        # shards batch across v7x's 2 TCs
            vmem_limit_bytes=32 * 1024 * 1024,        # headroom for large-tb intermediates
        ),
    )(x, g, w_packed, bs_packed)
    return out


def init_params(key, state_dim, goal_dim, action_dim, hidden=20, scale=None):
    """PyTorch-style uniform(+-1/sqrt(fan_in)) init; weights stored as (in, out) = W^T."""
    def linear(k, fan_in, fan_out):
        kw, kb = jax.random.split(k)
        bound = 1.0 / jnp.sqrt(jnp.float32(fan_in))
        w = jax.random.uniform(kw, (fan_in, fan_out), jnp.float32, -bound, bound)
        b = jax.random.uniform(kb, (fan_out,), jnp.float32, -bound, bound)
        return w, b

    k1, k2, k3 = jax.random.split(key, 3)
    w1, b1 = linear(k1, state_dim + goal_dim, hidden)
    w2, b2 = linear(k2, hidden, hidden)
    w3, b3 = linear(k3, hidden, action_dim)
    if scale is None:
        scale = jnp.ones((state_dim,), jnp.float32)  # torch.ones(state_dim)
    return {"w1": w1, "b1": b1, "w2": w2, "b2": b2, "w3": w3, "b3": b3,
            "scale": jnp.asarray(scale, jnp.float32)}


def reference_forward_f32(x, g, params):
    """Pure f32 JAX reference of the PyTorch forward (semantic check)."""
    h = jnp.concatenate([x, g], axis=1)
    h = jax.nn.relu(h @ params["w1"] + params["b1"])
    h = jax.nn.relu(h @ params["w2"] + params["b2"])
    a = jnp.tanh(h @ params["w3"] + params["b3"])
    return params["scale"] * a


def reference_forward_packed(x, g, w_packed, bs_packed, action_dim):
    """Mirrors the kernel's bf16-operand / f32-accumulate math exactly."""
    sd = x.shape[1]
    gd = g.shape[1]
    xb = x.astype(jnp.bfloat16)
    gb = g.astype(jnp.bfloat16)
    w1x = w_packed[0:sd]
    w1g = w_packed[LANE:LANE + gd]
    w2 = w_packed[2 * LANE:3 * LANE]
    w3 = w_packed[3 * LANE:4 * LANE]
    b1, b2, b3, scale = bs_packed[0], bs_packed[1], bs_packed[2], bs_packed[3]

    h = (jnp.dot(xb, w1x, preferred_element_type=jnp.float32)
         + jnp.dot(gb, w1g, preferred_element_type=jnp.float32))
    h = jnp.maximum(h + b1, 0.0)
    h = jnp.maximum(
        jnp.dot(h.astype(jnp.bfloat16), w2, preferred_element_type=jnp.float32) + b2, 0.0)
    a = jnp.dot(h.astype(jnp.bfloat16), w3, preferred_element_type=jnp.float32)
    a = jnp.tanh(a[:, :action_dim] + b3[:action_dim])
    return scale[:action_dim] * a


if __name__ == "__main__":
    # Small shapes consistent with the module; action_dim == state_dim so that
    # `scale` (shape (state_dim,)) broadcasts against the actor output, as in HIRO.
    B, state_dim, goal_dim = 8, 16, 8
    action_dim = state_dim
    hidden = 20

    key = jax.random.PRNGKey(0)
    kx, kg, kp, kx2, kg2 = jax.random.split(key, 5)
    x = jax.random.normal(kx, (B, state_dim), jnp.float32)
    g = jax.random.normal(kg, (B, goal_dim), jnp.float32)

    params = init_params(kp, state_dim, goal_dim, action_dim, hidden)
    packed = pack_params(params, state_dim, goal_dim, action_dim, hidden)

    out = manager_actor_forward(x, g, packed["w"], packed["bs"], action_dim)
    out = jax.block_until_ready(out)
    assert out.shape == (B, action_dim)

    # Exact-math check: same bf16 operands / f32 accumulation as the kernel.
    ref_bf16 = reference_forward_packed(x, g, packed["w"], packed["bs"], action_dim)
    assert jnp.allclose(out, ref_bf16, atol=1e-4, rtol=1e-4), "mismatch vs packed reference"

    # Semantic check vs the pure-f32 PyTorch-equivalent forward (bf16 weights
    # add small rounding, hence the looser tolerance).
    ref_f32 = reference_forward_f32(x, g, params)
    assert jnp.allclose(out, ref_f32, atol=2e-2, rtol=2e-2), "mismatch vs f32 reference"

    # Multi-tile check: exercises the batch grid ("parallel" axis, >1 step) and the
    # partial edge block (512 rows of 8-aligned batch 200 are covered by tb=128 tiles).
    B2 = 200
    x2 = jax.random.normal(kx2, (B2, state_dim), jnp.float32)
    g2 = jax.random.normal(kg2, (B2, goal_dim), jnp.float32)
    out2 = manager_actor_forward(x2, g2, packed["w"], packed["bs"], action_dim,
                                 block_batch=128)
    out2 = jax.block_until_ready(out2)
    assert out2.shape == (B2, action_dim)
    ref2 = reference_forward_packed(x2, g2, packed["w"], packed["bs"], action_dim)
    assert jnp.allclose(out2, ref2, atol=1e-4, rtol=1e-4), "mismatch on multi-tile batch"

    print("KERNEL_OK")
</pallas_src>

<mosaic_0001>
module attributes {stable_mosaic.version = 11 : i64} {
  func.func @manager_actor_kernel(%arg0: i32, %arg1: memref<8x16xf32, #tpu.memory_space<vmem>>, %arg2: memref<8x8xf32, #tpu.memory_space<vmem>>, %arg3: memref<512x128xbf16, #tpu.memory_space<vmem>>, %arg4: memref<8x128xf32, #tpu.memory_space<vmem>>, %arg5: memref<8x16xf32, #tpu.memory_space<vmem>>) attributes {dimension_semantics = [#tpu.dimension_semantics<parallel>], iteration_bounds = array<i64: 1>, scalar_prefetch = 0 : i64, scratch_operands = 0 : i64, tpu.core_type = #tpu.core_type<tc>, window_params = [{transform_indices = @transform_0, window_bounds = array<i64: 8, 16>}, {transform_indices = @transform_1, window_bounds = array<i64: 8, 8>}, {pipeline_mode = #tpu.pipeline_mode<synchronous>, transform_indices = @transform_2, window_bounds = array<i64: 512, 128>}, {pipeline_mode = #tpu.pipeline_mode<synchronous>, transform_indices = @transform_3, window_bounds = array<i64: 8, 128>}, {transform_indices = @transform_4, window_bounds = array<i64: 8, 16>}]} {
    %c0 = arith.constant 0 : index
    %c0_0 = arith.constant 0 : index
    %0 = vector.load %arg1[%c0, %c0_0] : memref<8x16xf32, #tpu.memory_space<vmem>>, vector<8x16xf32>
    %1 = arith.truncf %0 : vector<8x16xf32> to vector<8x16xbf16>
    %c0_1 = arith.constant 0 : index
    %c0_2 = arith.constant 0 : index
    %2 = vector.load %arg2[%c0_1, %c0_2] : memref<8x8xf32, #tpu.memory_space<vmem>>, vector<8x8xf32>
    %3 = arith.truncf %2 : vector<8x8xf32> to vector<8x8xbf16>
    %c0_3 = arith.constant 0 : index
    %c0_4 = arith.constant 0 : index
    %4 = vector.load %arg3[%c0_3, %c0_4] : memref<512x128xbf16, #tpu.memory_space<vmem>>, vector<16x128xbf16>
    %cst = arith.constant dense<0.000000e+00> : vector<8x128xf32>
    %5 = tpu.matmul %1, %4, %cst {dimension_numbers = #tpu.dot_dimension_numbers<[1], [0], [0], [1], [0, 0, 1, 1], [], []>} : vector<8x16xbf16>, vector<16x128xbf16>, vector<8x128xf32> -> vector<8x128xf32>
    %c128 = arith.constant 128 : index
    %c0_5 = arith.constant 0 : index
    %6 = vector.load %arg3[%c128, %c0_5] : memref<512x128xbf16, #tpu.memory_space<vmem>>, vector<8x128xbf16>
    %cst_6 = arith.constant dense<0.000000e+00> : vector<8x128xf32>
    %7 = tpu.matmul %3, %6, %cst_6 {dimension_numbers = #tpu.dot_dimension_numbers<[1], [0], [0], [1], [0, 0, 1, 1], [], []>} : vector<8x8xbf16>, vector<8x128xbf16>, vector<8x128xf32> -> vector<8x128xf32>
    %8 = arith.addf %5, %7 : vector<8x128xf32>
    %c0_7 = arith.constant 0 : index
    %c0_8 = arith.constant 0 : index
    %9 = vector.load %arg4[%c0_7, %c0_8] : memref<8x128xf32, #tpu.memory_space<vmem>>, vector<1x128xf32>
    %10 = vector.broadcast %9 : vector<1x128xf32> to vector<8x128xf32>
    %11 = arith.addf %8, %10 : vector<8x128xf32>
    %cst_9 = arith.constant 0.000000e+00 : f32
    %12 = vector.broadcast %cst_9 : f32 to vector<8x128xf32>
    %13 = arith.maximumf %11, %12 : vector<8x128xf32>
    %14 = arith.truncf %13 : vector<8x128xf32> to vector<8x128xbf16>
    %c256 = arith.constant 256 : index
    %c0_10 = arith.constant 0 : index
    %15 = vector.load %arg3[%c256, %c0_10] : memref<512x128xbf16, #tpu.memory_space<vmem>>, vector<128x128xbf16>
    %cst_11 = arith.constant dense<0.000000e+00> : vector<8x128xf32>
    %16 = tpu.matmul %14, %15, %cst_11 {dimension_numbers = #tpu.dot_dimension_numbers<[1], [0], [0], [1], [0, 0, 1, 1], [], []>} : vector<8x128xbf16>, vector<128x128xbf16>, vector<8x128xf32> -> vector<8x128xf32>
    %c1 = arith.constant 1 : index
    %c0_12 = arith.constant 0 : index
    %17 = vector.load %arg4[%c1, %c0_12] : memref<8x128xf32, #tpu.memory_space<vmem>>, vector<1x128xf32>
    %18 = vector.broadcast %17 : vector<1x128xf32> to vector<8x128xf32>
    %19 = arith.addf %16, %18 : vector<8x128xf32>
    %cst_13 = arith.constant 0.000000e+00 : f32
    %20 = vector.broadcast %cst_13 : f32 to vector<8x128xf32>
    %21 = arith.maximumf %19, %20 : vector<8x128xf32>
    %22 = arith.truncf %21 : vector<8x128xf32> to vector<8x128xbf16>
    %c384 = arith.constant 384 : index
    %c0_14 = arith.constant 0 : index
    %23 = vector.load %arg3[%c384, %c0_14] : memref<512x128xbf16, #tpu.memory_space<vmem>>, vector<128x128xbf16>
    %cst_15 = arith.constant dense<0.000000e+00> : vector<8x128xf32>
    %24 = tpu.matmul %22, %23, %cst_15 {dimension_numbers = #tpu.dot_dimension_numbers<[1], [0], [0], [1], [0, 0, 1, 1], [], []>} : vector<8x128xbf16>, vector<128x128xbf16>, vector<8x128xf32> -> vector<8x128xf32>
    %25 = vector.extract_strided_slice %24 {offsets = [0, 0], sizes = [8, 16], strides = [1, 1]} : vector<8x128xf32> to vector<8x16xf32>
    %c2 = arith.constant 2 : index
    %c0_16 = arith.constant 0 : index
    %26 = vector.load %arg4[%c2, %c0_16] : memref<8x128xf32, #tpu.memory_space<vmem>>, vector<1x16xf32>
    %27 = vector.broadcast %26 : vector<1x16xf32> to vector<8x16xf32>
    %28 = arith.addf %25, %27 : vector<8x16xf32>
    %29 = math.tanh %28 : vector<8x16xf32>
    %c3 = arith.constant 3 : index
    %c0_17 = arith.constant 0 : index
    %30 = vector.load %arg4[%c3, %c0_17] : memref<8x128xf32, #tpu.memory_space<vmem>>, vector<1x16xf32>
    %31 = vector.broadcast %30 : vector<1x16xf32> to vector<8x16xf32>
    %32 = arith.mulf %31, %29 : vector<8x16xf32>
    %c0_18 = arith.constant 0 : index
    %c0_19 = arith.constant 0 : index
    %33 = vector.load %arg5[%c0_18, %c0_19] : memref<8x16xf32, #tpu.memory_space<vmem>>, vector<8x16xf32>
    tpu.vector_store %arg5[%c0_18, %c0_19], %32 {strides = array<i32>} : memref<8x16xf32, #tpu.memory_space<vmem>>, vector<8x16xf32>,
    return
  }
  func.func @transform_0(%arg0: i32) -> (i32, i32) {
    %c0_i32 = arith.constant 0 : i32
    %c0_i32_0 = arith.constant 0 : i32
    return %arg0, %c0_i32 : i32, i32
  }
  func.func @transform_1(%arg0: i32) -> (i32, i32) {
    %c0_i32 = arith.constant 0 : i32
    %c0_i32_0 = arith.constant 0 : i32
    return %arg0, %c0_i32 : i32, i32
  }
  func.func @transform_2(%arg0: i32) -> (i32, i32) {
    %c0_i32 = arith.constant 0 : i32
    %c0_i32_0 = arith.constant 0 : i32
    %c0_i32_1 = arith.constant 0 : i32
    return %c0_i32, %c0_i32_0 : i32, i32
  }
  func.func @transform_3(%arg0: i32) -> (i32, i32) {
    %c0_i32 = arith.constant 0 : i32
    %c0_i32_0 = arith.constant 0 : i32
    %c0_i32_1 = arith.constant 0 : i32
    return %c0_i32, %c0_i32_0 : i32, i32
  }
  func.func @transform_4(%arg0: i32) -> (i32, i32) {
    %c0_i32 = arith.constant 0 : i32
    %c0_i32_0 = arith.constant 0 : i32
    return %arg0, %c0_i32 : i32, i32
  }
}

</mosaic_0001>

<bundles_post_ra>
// kernel: tpu_custom_call.1
= control target key start
LH: loop header
LB: loop body
LE: loop exit
PB: predicated region body
PF: predicated region fallthrough
CT: control target
= control target key end

     0   :  { %9 = vsyncpa [#allocation3], 0  ;;  %s753_s0 = inlined_call_operand.hbm [shape: f32[8,16], index: 0, kind: input, shape index: {}]   ;;  %s754_s1 = inlined_call_operand.hbm [shape: f32[8,8], index: 1, kind: input, shape index: {}]   ;;  %s755_s2 = inlined_call_operand.hbm [shape: bf16[512,128], index: 2, kind: input, shape index: {}]   ;;  %s756_s3 = inlined_call_operand.vmem [shape: f32[8,128], index: 3, kind: input, shape index: {}]   ;;  %s757_s4 = inlined_call_operand.hbm [shape: f32[8,16], index: 4, kind: output, shape index: {}]  }
   0x1   :  { %10 = vsyncpa [#allocation6], 0 }
   0x2   :  { %11 = vsyncpa [#allocation4], 0  ;;  %s632_s15 = smov [#allocation5]   ;;  %s633_s17 = smov [#allocation2]  }
   0x3   :  { %s28_s16 = sshll.u32 %s632_s15, 4  ;;  %s18_s18 = sshll.u32 %s633_s17, 4  ;;  %s29_s16 = int_to_ptr.vmem [resolvable:$true] %s28_s16  ;;  %s19_s18 = int_to_ptr.vmem [resolvable:$true] %s18_s18 }
   0x4   :  { %s538_s21 = scalar_lea.hbm %s754_s1, 128 }
   0x5   :  { %p539_p0 = scmp.ne.s32.totalorder %s754_s1, %s538_s21  ;;  %p542_p1 = scmp.lt.u32.totalorder %s538_s21, %s754_s1 }
   0x7   :  { %p544_p2 = pnand %p542_p1, %p539_p0 }
   0x9   :  { %547 = shalt.err (!%p544_p2)
}
   0xa   :  { %s548_s26 = scalar_lea.vmem %s29_s16, 128  ;;  %p553_p4 = scmp.lt.s32.totalorder %s29_s16, %s29_s16 }
   0xb   :  { %p549_p3 = scmp.ne.s32.totalorder %s29_s16, %s548_s26  ;;  %p554_p5 = scmp.lt.s32.totalorder %s548_s26, %s548_s26 }
   0xd   :  { %p555_p6 = por %p554_p5, %p553_p4 }
   0xf   :  { %p556_p7 = pnand %p555_p6, %p549_p3 }
  0x11   :  { %559 = shalt.err (!%p556_p7)
}
  0x12   :  { %31 = dma.hbm_to_vmem [thread:$0]  %s754_s1, 128, %s29_s16, [#allocation6]  }
  0x13   :  { %s560_s5 = scalar_lea.hbm %s753_s0, 128 }
  0x14   :  { %p561_p8 = scmp.ne.s32.totalorder %s753_s0, %s560_s5  ;;  %p564_p9 = scmp.lt.u32.totalorder %s560_s5, %s753_s0 }
  0x16   :  { %p566_p10 = pnand %p564_p9, %p561_p8 }
  0x18   :  { %569 = shalt.err (!%p566_p10)
}
  0x19   :  { %s570_s10 = scalar_lea.vmem %s19_s18, 128  ;;  %p575_p12 = scmp.lt.s32.totalorder %s19_s18, %s19_s18 }
  0x1a   :  { %p571_p11 = scmp.ne.s32.totalorder %s19_s18, %s570_s10  ;;  %p576_p13 = scmp.lt.s32.totalorder %s570_s10, %s570_s10 }
  0x1c   :  { %p577_p0 = por %p576_p13, %p575_p12 }
  0x1e   :  { %p578_p1 = pnand %p577_p0, %p571_p11 }
  0x20   :  { %581 = shalt.err (!%p578_p1)
}
  0x21   :  { %21 = dma.hbm_to_vmem [thread:$0]  %s753_s0, 128, %s19_s18, [#allocation3]  }
  0x22   :  { %s634_s12 = smov [#allocation7]   ;;  %s582_s16 = scalar_lea.hbm %s755_s2, 4096 }
  0x23   :  { %s37_s13 = sshll.u32 %s634_s12, 4  ;;  %p583_p2 = scmp.ne.s32.totalorder %s755_s2, %s582_s16  ;;  %s38_s13 = int_to_ptr.vmem [resolvable:$true] %s37_s13 }
  0x24   :  { %p586_p3 = scmp.lt.u32.totalorder %s582_s16, %s755_s2 }
  0x26   :  { %p588_p4 = pnand %p586_p3, %p583_p2 }
  0x28   :  { %591 = shalt.err (!%p588_p4)
}
  0x29   :  { %s592_s22 = scalar_lea.vmem %s38_s13, 4096  ;;  %p597_p6 = scmp.lt.s32.totalorder %s38_s13, %s38_s13 }
  0x2a   :  { %p593_p5 = scmp.ne.s32.totalorder %s38_s13, %s592_s22  ;;  %p598_p7 = scmp.lt.s32.totalorder %s592_s22, %s592_s22 }
  0x2c   :  { %p599_p8 = por %p598_p7, %p597_p6 }
  0x2e   :  { %p600_p9 = pnand %p599_p8, %p593_p5 }
  0x30   :  { %603 = shalt.err (!%p600_p9)
}
  0x31   :  { %s635_s0 = smov 64   ;;  %s636_s18 = smov 4  }
  0x32   :  { %43 = dma.hbm_to_vmem [thread:$0]  %s755_s2, 4096, %s38_s13, [#allocation6], %s635_s0, %s635_s0, %s636_s18  }
  0x33   :  { %626 = dma.done.wait [#allocation3], 128  }
  0x34   :  { %627 = vsyncadd [#allocation3], 4294967168 }
  0x35   :  { %628 = dma.done.wait [#allocation6], 4224  }
  0x36   :  { %629 = vsyncadd [#allocation6], 4294963072  ;;  %v637_v0 = vmov 0.0   ;;  %vm638_vm0 = vmmov 0   ;;  %vm67_vm1 = vcmask 1043456   ;;  %v519_v3 = vld [vmem:[#allocation7] sm:$0xff]  }
  0x37   :  { %459 = vmatprep.subr.bf16.mxu0 %v637_v0  ;;  %465 = vmatprep.subr.bf16.mxu1 %v637_v0  ;;  %v62_v1 = vld [vmem:[#allocation7 + $0x40] sm:$0xf]  ;;  %v58_v4 = vld [vmem:[#allocation5] sm:$0xff]  ;;  %v56_v5 = vld [vmem:[#allocation2] sm:$0xff]  ;;  %vm63_vm2 = vcmask 64512   ;;  %vm117_vm3 = vcmask 130048  }
  0x38   :  { %461 = vmatprep.mubr.msk.bf16.mxu0 %vm638_vm0, %v637_v0  ;;  %467 = vmatprep.mubr.msk.bf16.mxu1 %vm638_vm0, %v637_v0  ;;  %v69_v2 = vsel %vm67_vm1, %v62_v1, 0  ;;  %v59_v6 = vpack.c.bf16 %v58_v4, %v58_v4  ;;  %v57_v7 = vpack.c.bf16 %v56_v5, %v56_v5  ;;  %v520_v8 = vld [vmem:[#allocation7 + $0x80] sm:$0xff]   ;;  %v521_v9 = vld [vmem:[#allocation7 + $0x88] sm:$0xff]   ;;  %v522_v10 = vld [vmem:[#allocation7 + $0x90] sm:$0xff]   ;;  %s639_s6 = smov [#allocation8]  }
  0x39   :  { %460 = vmatpush3.bf16.msra.mxu0 %v69_v2  ;;  %466 = vmatpush3.bf16.msra.mxu1 %v519_v3  ;;  %v523_v11 = vld [vmem:[#allocation7 + $0x98] sm:$0xff]   ;;  %v524_v12 = vld [vmem:[#allocation7 + $0xa0] sm:$0xff]   ;;  %v525_v13 = vld [vmem:[#allocation7 + $0xa8] sm:$0xff]   ;;  %s404_s7 = sshll.u32 %s639_s6, 4  ;;  %s405_s7 = int_to_ptr.vmem [resolvable:$true] %s404_s7 }
  0x3a   :  { %471 = vmatprep.subr.bf16.mxu0 %v637_v0  ;;  %491 = vmatprep.subr.bf16.mxu1 %v637_v0  ;;  %v526_v14 = vld [vmem:[#allocation7 + $0xb0] sm:$0xff]   ;;  %v527_v15 = vld [vmem:[#allocation7 + $0xb8] sm:$0xff]   ;;  %v528_v16 = vld [vmem:[#allocation7 + $0xc0] sm:$0xff]   ;;  %s604_s8 = scalar_lea.vmem %s405_s7, 128  ;;  %p609_p11 = scmp.lt.s32.totalorder %s405_s7, %s405_s7 }
  0x3b   :  { %v529_v17 = vld [vmem:[#allocation7 + $0xc8] sm:$0xff]   ;;  %v530_v18 = vld [vmem:[#allocation7 + $0xd0] sm:$0xff]   ;;  %v531_v19 = vld [vmem:[#allocation7 + $0xd8] sm:$0xff]   ;;  %p605_p10 = scmp.ne.s32.totalorder %s405_s7, %s604_s8  ;;  %p610_p12 = scmp.lt.s32.totalorder %s604_s8, %s604_s8 }
  0x3c   :  { %462 = vmatmul.mubr.msk.bf16.vlgmr.msra.gmra.mrb[0].mxu0 %vm63_vm2, %v59_v6  ;;  %468 = vmatmul.mubr.msk.bf16.vlgmr.msra.gmra.mrb[0].mxu1 %vm117_vm3, %v57_v7  ;;  %v532_v20 = vld [vmem:[#allocation7 + $0xe0] sm:$0xff]   ;;  %v533_v21 = vld [vmem:[#allocation7 + $0xe8] sm:$0xff]   ;;  %v417_v25 = vld [vmem:[%s756_s3] ss:$0 sm:$0xff] }
  0x3d   :  { %472 = vmatpush3.bf16.msra.mxu0 %v520_v8  ;;  %487 = vmatprep.mubr.msk.bf16.mxu0 %vm638_vm0, %v637_v0  ;;  %v534_v35 = vld [vmem:[#allocation7 + $0xf0] sm:$0xff]   ;;  %v535_v36 = vld [vmem:[#allocation7 + $0xf8] sm:$0xff]   ;;  %p611_p13 = por %p610_p12, %p609_p11 }
  0x3e   :  { %473 = vmatprep.subr.bf16.mxu0 %v637_v0  ;;  %507 = vmatprep.mubr.msk.bf16.mxu1 %vm638_vm0, %v637_v0  ;;  %v418_v37 = vld [vmem:[%s756_s3 + $0x1] ss:$0 sm:$0xff]  ;;  %v435_v45 = vld [vmem:[%s756_s3 + $0x2] ss:$0 sm:$0xff]  ;;  %v436_v51 = vld [vmem:[%s756_s3 + $0x3] ss:$0 sm:$0xff] }
  0x3f   :  { %492 = vmatpush3.bf16.msra.mxu1 %v528_v16  ;;  %p612_p0 = pnand %p611_p13, %p605_p10 }
  0x40   :  { %493 = vmatprep.subr.bf16.mxu1 %v637_v0 }
  0x41   :  { %474 = vmatpush3.bf16.msra.mxu0 %v521_v9 }
  0x42   :  { %475 = vmatprep.subr.bf16.mxu0 %v637_v0 }
  0x43   :  { %494 = vmatpush3.bf16.msra.mxu1 %v529_v17 }
  0x44   :  { %495 = vmatprep.subr.bf16.mxu1 %v637_v0 }
  0x45   :  { %476 = vmatpush3.bf16.msra.mxu0 %v522_v10 }
  0x46   :  { %477 = vmatprep.subr.bf16.mxu0 %v637_v0 }
  0x47   :  { %496 = vmatpush3.bf16.msra.mxu1 %v530_v18 }
  0x48   :  { %497 = vmatprep.subr.bf16.mxu1 %v637_v0 }
  0x49   :  { %478 = vmatpush3.bf16.msra.mxu0 %v523_v11 }
  0x4a   :  { %479 = vmatprep.subr.bf16.mxu0 %v637_v0 }
  0x4b   :  { %498 = vmatpush3.bf16.msra.mxu1 %v531_v19 }
  0x4c   :  { %499 = vmatprep.subr.bf16.mxu1 %v637_v0 }
  0x4d   :  { %480 = vmatpush3.bf16.msra.mxu0 %v524_v12 }
  0x4e   :  { %481 = vmatprep.subr.bf16.mxu0 %v637_v0 }
  0x4f   :  { %500 = vmatpush3.bf16.msra.mxu1 %v532_v20 }
  0x50   :  { %501 = vmatprep.subr.bf16.mxu1 %v637_v0 }
  0x51   :  { %482 = vmatpush3.bf16.msra.mxu0 %v525_v13 }
  0x52   :  { %483 = vmatprep.subr.bf16.mxu0 %v637_v0 }
  0x53   :  { %502 = vmatpush3.bf16.msra.mxu1 %v533_v21 }
  0x54   :  { %503 = vmatprep.subr.bf16.mxu1 %v637_v0 }
  0x55   :  { %484 = vmatpush3.bf16.msra.mxu0 %v526_v14 }
  0x56   :  { %485 = vmatprep.subr.bf16.mxu0 %v637_v0 }
  0x57   :  { %504 = vmatpush3.bf16.msra.mxu1 %v534_v35 }
  0x58   :  { %505 = vmatprep.subr.bf16.mxu1 %v637_v0 }
  0x59   :  { %486 = vmatpush3.bf16.msra.mxu0 %v527_v15 }
  0x5b   :  { %506 = vmatpush3.bf16.msra.mxu1 %v535_v36 }
 0x10f   :  { %v105_v22 = vpop.f32.mrb[0].mxu0  ;;  %v155_v24 = vpop.f32.mrb[0].mxu1 }
 0x110   :  { %v463_v23 = vpop.f32.mrb[1].mxu0  ;;  %v156_v26 = vadd.f32 %v155_v24, %v105_v22  ;;  %v469_v28 = vpop.f32.mrb[1].mxu1 }
 0x111   :  { %v108_v27 = vpop.f32.mrb[2].mxu0  ;;  %v158_v30 = vpop.f32.mrb[2].mxu1 }
 0x112   :  { %v464_v29 = vpop.f32.mrb[3].mxu0  ;;  %v166_v31 = vadd.f32 %v417_v25, %v156_v26  ;;  %v470_v32 = vpop.f32.mrb[3].mxu1 }
 0x114   :  { %v167_v33 = vmax.f32 %v166_v31, 0.0 }
 0x116   :  { %v168_v34 = vpack.c.bf16 %v167_v33, %v167_v33 }
 0x118   :  { %488 = vmatmul.mubr.bf16.vlgmr.msra.gmra.mrb[4].mxu0 %v168_v34 }
 0x1eb   :  { %v272_v38 = vpop.f32.mrb[4].mxu0 }
 0x1ec   :  { %v273_v39 = vadd.f32 %v418_v37, %v272_v38  ;;  %v489_v40 = vpop.f32.mrb[5].mxu0 }
 0x1ed   :  { %v275_v41 = vpop.f32.mrb[6].mxu0 }
 0x1ee   :  { %v278_v42 = vmax.f32 %v273_v39, 0.0  ;;  %v490_v43 = vpop.f32.mrb[7].mxu0 }
 0x1f0   :  { %v279_v44 = vpack.c.bf16 %v278_v42, %v278_v42 }
 0x1f2   :  { %508 = vmatmul.mubr.bf16.vlgmr.msra.gmra.mrb[4].mxu1 %v279_v44 }
 0x2c5   :  { %v378_v46 = vpop.f32.mrb[4].mxu1 }
 0x2c6   :  { %v389_v47 = vadd.f32 %v435_v45, %v378_v46  ;;  %v509_v48 = vpop.f32.mrb[5].mxu1 }
 0x2c7   :  { %v381_v49 = vpop.f32.mrb[6].mxu1 }
 0x2c8   :  { %536 = vtanh.f32 %v389_v47  ;;  %v510_v50 = vpop.f32.mrb[7].mxu1 }
 0x2d2   :  { %v537_v52 = vpop.eup %536 }
 0x2d3   :  { %v396_v53 = vmul.f32 %v537_v52, %v436_v51 }
 0x2d5   :  { %397 = vst.msk [vmem:[#allocation8] sm:$0xff] %vm117_vm3, %v396_v53 }
 0x2d6   :  { %615 = shalt.err (!%p612_p0)
}
 0x2d7   :  { %s616_s1 = scalar_lea.hbm %s757_s4, 128 }
 0x2d8   :  { %p617_p1 = scmp.ne.s32.totalorder %s757_s4, %s616_s1  ;;  %p620_p2 = scmp.lt.u32.totalorder %s616_s1, %s757_s4 }
 0x2da   :  { %p622_p3 = pnand %p620_p2, %p617_p1 }
 0x2dc   :  { %625 = shalt.err (!%p622_p3)
}
 0x2dd   :  { %407 = dma.vmem_to_hbm [thread:$0]  %s405_s7, 128, %s757_s4, [#allocation4]  }
 0x2de   :  { %630 = dma.done.wait [#allocation4], 128  }
 0x2df   :  { %631 = vsyncadd [#allocation4], 4294967168 }
 0x2e0   :  { %411 = vsyncpa [#allocation3], 1 }
 0x2e1   :  { %412 = vsyncpa [#allocation6], 1 }
 0x2e2   :  { %413 = vsyncpa [#allocation4], 1 }

</bundles_post_ra>
